<compile_context>
chip_gen: v6e
topology: v6e:2x2x1
jax: 0.10.0
libtpu: 0.0.40
codegen_flags: <defaults>
</compile_context>

<pallas_src>
import functools

import jax
import jax.numpy as jnp
from jax.experimental import pallas as pl
from jax.experimental.pallas import tpu as pltpu

# ------------------------- synthetic config ---------------------------------
N_LEVELS = 8            # xyz_encoding_config.n_levels
N_FEATS_PER_LEVEL = 2   # xyz_encoding_config.n_features_per_level
TABLE_SIZE = 2 ** 14    # hashmap size per level
BASE_RES = 16
GROWTH = 1.5
D_ENC = N_LEVELS * N_FEATS_PER_LEVEL   # = 16 (network_input_dim)
N_NEURONS = 64                         # mlp_network_config.n_neurons
FEATURE_DIM = 16                       # config.feature_dim
CURRENT_LEVEL = 4                      # self.current_level
DENSITY_BIAS = -1.0                    # config.density_bias
MAX_TM = 2048                          # cap on row tile (KiB-scale VMEM use)


# --------------------------- Pallas kernel ----------------------------------
def _mlp_kernel(h_ref, w1_ref, b1_ref, w2_ref, b2_ref, fea_ref):
    # Linear(D_ENC,64) -> ReLU -> Linear(64,FEATURE_DIM)
    # h / w1 / w2 are bf16 (halves DMA bytes, doubles MXU rate); accumulation,
    # bias add and ReLU stay in f32 (v5e VPU has no native bf16 math).
    z1 = jnp.dot(h_ref[...], w1_ref[...], preferred_element_type=jnp.float32)
    a1 = jnp.maximum(z1 + b1_ref[...], 0.0)                         # (TM, HID) f32
    z2 = jnp.dot(a1.astype(jnp.bfloat16), w2_ref[...],
                 preferred_element_type=jnp.float32)
    fea_ref[...] = (z2 + b2_ref[...]).astype(fea_ref.dtype)         # (TM, FEA)


def _pick_tm(n):
    # Largest power-of-two tile <= MAX_TM that still leaves >= 2 grid steps
    # (so the "parallel" axis shards across v7x's two TensorCores); never go
    # below 128 rows (tiny-N case just pads up to one 128-row tile).
    tm = MAX_TM
    while tm > 128 and tm * 2 > n:
        tm //= 2
    return tm


def mlp_head(h, w1, b1, w2, b2):
    n = h.shape[0]
    tm = _pick_tm(n)
    n_pad = ((n + tm - 1) // tm) * tm
    if n_pad != n:
        h = jnp.pad(h, ((0, n_pad - n), (0, 0)))
    grid = (n_pad // tm,)

    fea = pl.pallas_call(
        _mlp_kernel,
        out_shape=jax.ShapeDtypeStruct((n_pad, FEATURE_DIM), jnp.float32),
        grid_spec=pltpu.PrefetchScalarGridSpec(
            num_scalar_prefetch=0,
            grid=grid,
            in_specs=[
                pl.BlockSpec((tm, D_ENC), lambda i: (i, 0)),
                pl.BlockSpec((D_ENC, N_NEURONS), lambda i: (0, 0)),
                pl.BlockSpec((1, N_NEURONS), lambda i: (0, 0)),
                pl.BlockSpec((N_NEURONS, FEATURE_DIM), lambda i: (0, 0)),
                pl.BlockSpec((1, FEATURE_DIM), lambda i: (0, 0)),
            ],
            out_specs=pl.BlockSpec((tm, FEATURE_DIM), lambda i: (i, 0)),
        ),
        compiler_params=pltpu.CompilerParams(
            dimension_semantics=("parallel",),
            vmem_limit_bytes=32 * 1024 * 1024),   # v5e default is only 16 MiB
    )(h, w1, b1, w2, b2)
    return fea[:n]


# -------------------- JAX glue: contraction + hash encoding ------------------
def contract_points(pts, xyz_min, xyz_max):
    # AABB contraction to [0, 1]^3
    u = (pts - xyz_min) / (xyz_max - xyz_min)
    return jnp.clip(u, 0.0, 1.0)


def _hash3(ix, iy, iz):
    # tcnn-style spatial hash (uint32 wraparound multiply + xor)
    ix = ix.astype(jnp.uint32)
    iy = iy.astype(jnp.uint32)
    iz = iz.astype(jnp.uint32)
    h = ix ^ (iy * jnp.uint32(2654435761)) ^ (iz * jnp.uint32(805459861))
    return (h % jnp.uint32(TABLE_SIZE)).astype(jnp.int32)


def hash_encoding(pts01, tables):
    # TODO(synk): data-dependent hash-table gather has no clean Pallas
    # equivalent on TPU; kept in plain JAX (the MLP hot path is in Pallas).
    feats = []
    for lvl in range(N_LEVELS):
        res = float(int(BASE_RES * (GROWTH ** lvl)))
        x = pts01 * res
        x0 = jnp.floor(x).astype(jnp.int32)
        frac = x - x0.astype(jnp.float32)                       # (N, 3)
        acc = jnp.zeros((pts01.shape[0], N_FEATS_PER_LEVEL), jnp.float32)
        for dx in (0, 1):
            for dy in (0, 1):
                for dz in (0, 1):
                    wx = frac[:, 0] if dx else 1.0 - frac[:, 0]
                    wy = frac[:, 1] if dy else 1.0 - frac[:, 1]
                    wz = frac[:, 2] if dz else 1.0 - frac[:, 2]
                    w = (wx * wy * wz)[:, None]
                    idx = _hash3(x0[:, 0] + dx, x0[:, 1] + dy, x0[:, 2] + dz)
                    acc = acc + w * tables[lvl][idx]
        feats.append(acc)
    return jnp.concatenate(feats, axis=-1)                      # (N, D_ENC)


@functools.partial(jax.jit, static_argnames=("with_fea",))
def vanilla_mlp_forward(pts, params, with_fea=True):
    pts01 = contract_points(pts, params["xyz_min"], params["xyz_max"])
    h = hash_encoding(pts01, params["tables"]).astype(jnp.float32)

    # progressive mask buffer: mask[: level * n_features_per_level] = 1.
    # CURRENT_LEVEL is static, so fold the mask into w1 (zero masked input
    # rows) instead of multiplying h inside the kernel.
    mask = (jnp.arange(D_ENC) < CURRENT_LEVEL * N_FEATS_PER_LEVEL)
    mask = mask.astype(jnp.float32)[:, None]                    # (D_ENC, 1)
    w1_masked = (params["w1"] * mask).astype(jnp.bfloat16)
    w2_bf16 = params["w2"].astype(jnp.bfloat16)

    fea = mlp_head(h.astype(jnp.bfloat16), w1_masked, params["b1"],
                   w2_bf16, params["b2"])                       # (N, FEATURE_DIM) f32

    # sigma = trunc_exp(fea[:, 0] + density_bias); _TruncExp.forward is a plain
    # exp (the clamp only affects the backward pass). Computed here on data we
    # already return so the kernel keeps a lane-dense single output.
    sigma = jnp.exp(fea[:, 0] + DENSITY_BIAS)

    result = {"sigma": sigma}
    if with_fea:
        result["fea"] = fea
    # TODO(synk): with_grad=True branch (autograd normals) not implemented.
    return result


# ------------------------------- params -------------------------------------
def init_params(key):
    k_tab, k_w1, k_w2 = jax.random.split(key, 3)
    # hash tables: tcnn default init U(-1e-4, 1e-4)
    tables = jax.random.uniform(
        k_tab, (N_LEVELS, TABLE_SIZE, N_FEATS_PER_LEVEL),
        minval=-1e-4, maxval=1e-4, dtype=jnp.float32)
    # baseImplicitRep.setup overwrites all Linear weights with N(0, 0.05),
    # biases stay 0 (make_linear constant_ init).  Stored as (in, out).
    w1 = 0.05 * jax.random.normal(k_w1, (D_ENC, N_NEURONS), jnp.float32)
    b1 = jnp.zeros((1, N_NEURONS), jnp.float32)
    w2 = 0.05 * jax.random.normal(k_w2, (N_NEURONS, FEATURE_DIM), jnp.float32)
    b2 = jnp.zeros((1, FEATURE_DIM), jnp.float32)
    # setup(center=0, scale=1): xyz_min = -1, xyz_max = 1
    center = jnp.zeros((3,), jnp.float32)
    scale = jnp.ones((3,), jnp.float32)
    xyz_min = -jnp.ones((3,), jnp.float32) * scale + center
    xyz_max = jnp.ones((3,), jnp.float32) * scale + center
    return dict(tables=tables, w1=w1, b1=b1, w2=w2, b2=b2,
                xyz_min=xyz_min, xyz_max=xyz_max)


# -------------------------------- main ---------------------------------------
if __name__ == "__main__":
    key = jax.random.PRNGKey(0)
    k_pts, k_par = jax.random.split(key)
    N = 256  # number of query points (tile picker keeps a 2-step grid here)
    pts = jax.random.uniform(k_pts, (N, 3), minval=-1.0, maxval=1.0,
                             dtype=jnp.float32)
    params = init_params(k_par)

    out = vanilla_mlp_forward(pts, params, with_fea=True)
    jax.block_until_ready(out)

    assert out["sigma"].shape == (N,)
    assert out["fea"].shape == (N, FEATURE_DIM)
    assert bool(jnp.all(out["sigma"] > 0.0))
    assert bool(jnp.all(jnp.isfinite(out["fea"])))
    print("KERNEL_OK")
</pallas_src>

<mosaic_0001>
module attributes {stable_mosaic.version = 11 : i64} {
  func.func @_mlp_kernel(%arg0: i32, %arg1: memref<128x16xbf16, #tpu.memory_space<vmem>>, %arg2: memref<16x64xbf16, #tpu.memory_space<vmem>>, %arg3: memref<1x64xf32, #tpu.memory_space<vmem>>, %arg4: memref<64x16xbf16, #tpu.memory_space<vmem>>, %arg5: memref<1x16xf32, #tpu.memory_space<vmem>>, %arg6: memref<128x16xf32, #tpu.memory_space<vmem>>) attributes {dimension_semantics = [#tpu.dimension_semantics<parallel>], iteration_bounds = array<i64: 2>, scalar_prefetch = 0 : i64, scratch_operands = 0 : i64, tpu.core_type = #tpu.core_type<tc>, window_params = [{transform_indices = @transform_0, window_bounds = array<i64: 128, 16>}, {pipeline_mode = #tpu.pipeline_mode<synchronous>, transform_indices = @transform_1, window_bounds = array<i64: 16, 64>}, {pipeline_mode = #tpu.pipeline_mode<synchronous>, transform_indices = @transform_2, window_bounds = array<i64: 1, 64>}, {pipeline_mode = #tpu.pipeline_mode<synchronous>, transform_indices = @transform_3, window_bounds = array<i64: 64, 16>}, {pipeline_mode = #tpu.pipeline_mode<synchronous>, transform_indices = @transform_4, window_bounds = array<i64: 1, 16>}, {transform_indices = @transform_5, window_bounds = array<i64: 128, 16>}]} {
    %c0 = arith.constant 0 : index
    %c0_0 = arith.constant 0 : index
    %0 = vector.load %arg1[%c0, %c0_0] : memref<128x16xbf16, #tpu.memory_space<vmem>>, vector<128x16xbf16>
    %c0_1 = arith.constant 0 : index
    %c0_2 = arith.constant 0 : index
    %1 = vector.load %arg2[%c0_1, %c0_2] : memref<16x64xbf16, #tpu.memory_space<vmem>>, vector<16x64xbf16>
    %cst = arith.constant dense<0.000000e+00> : vector<128x64xf32>
    %2 = tpu.matmul %0, %1, %cst {dimension_numbers = #tpu.dot_dimension_numbers<[1], [0], [0], [1], [0, 0, 1, 1], [], []>} : vector<128x16xbf16>, vector<16x64xbf16>, vector<128x64xf32> -> vector<128x64xf32>
    %c0_3 = arith.constant 0 : index
    %c0_4 = arith.constant 0 : index
    %3 = vector.load %arg3[%c0_3, %c0_4] : memref<1x64xf32, #tpu.memory_space<vmem>>, vector<1x64xf32>
    %4 = vector.broadcast %3 : vector<1x64xf32> to vector<128x64xf32>
    %5 = arith.addf %2, %4 : vector<128x64xf32>
    %cst_5 = arith.constant 0.000000e+00 : f32
    %6 = vector.broadcast %cst_5 : f32 to vector<128x64xf32>
    %7 = arith.maximumf %5, %6 : vector<128x64xf32>
    %8 = arith.truncf %7 : vector<128x64xf32> to vector<128x64xbf16>
    %c0_6 = arith.constant 0 : index
    %c0_7 = arith.constant 0 : index
    %9 = vector.load %arg4[%c0_6, %c0_7] : memref<64x16xbf16, #tpu.memory_space<vmem>>, vector<64x16xbf16>
    %cst_8 = arith.constant dense<0.000000e+00> : vector<128x16xf32>
    %10 = tpu.matmul %8, %9, %cst_8 {dimension_numbers = #tpu.dot_dimension_numbers<[1], [0], [0], [1], [0, 0, 1, 1], [], []>} : vector<128x64xbf16>, vector<64x16xbf16>, vector<128x16xf32> -> vector<128x16xf32>
    %c0_9 = arith.constant 0 : index
    %c0_10 = arith.constant 0 : index
    %11 = vector.load %arg5[%c0_9, %c0_10] : memref<1x16xf32, #tpu.memory_space<vmem>>, vector<1x16xf32>
    %12 = vector.broadcast %11 : vector<1x16xf32> to vector<128x16xf32>
    %13 = arith.addf %10, %12 : vector<128x16xf32>
    %c0_11 = arith.constant 0 : index
    %c0_12 = arith.constant 0 : index
    %14 = vector.load %arg6[%c0_11, %c0_12] : memref<128x16xf32, #tpu.memory_space<vmem>>, vector<128x16xf32>
    tpu.vector_store %arg6[%c0_11, %c0_12], %13 {strides = array<i32>} : memref<128x16xf32, #tpu.memory_space<vmem>>, vector<128x16xf32>,
    return
  }
  func.func @transform_0(%arg0: i32) -> (i32, i32) {
    %c0_i32 = arith.constant 0 : i32
    %c0_i32_0 = arith.constant 0 : i32
    return %arg0, %c0_i32 : i32, i32
  }
  func.func @transform_1(%arg0: i32) -> (i32, i32) {
    %c0_i32 = arith.constant 0 : i32
    %c0_i32_0 = arith.constant 0 : i32
    %c0_i32_1 = arith.constant 0 : i32
    return %c0_i32, %c0_i32_0 : i32, i32
  }
  func.func @transform_2(%arg0: i32) -> (i32, i32) {
    %c0_i32 = arith.constant 0 : i32
    %c0_i32_0 = arith.constant 0 : i32
    %c0_i32_1 = arith.constant 0 : i32
    return %c0_i32, %c0_i32_0 : i32, i32
  }
  func.func @transform_3(%arg0: i32) -> (i32, i32) {
    %c0_i32 = arith.constant 0 : i32
    %c0_i32_0 = arith.constant 0 : i32
    %c0_i32_1 = arith.constant 0 : i32
    return %c0_i32, %c0_i32_0 : i32, i32
  }
  func.func @transform_4(%arg0: i32) -> (i32, i32) {
    %c0_i32 = arith.constant 0 : i32
    %c0_i32_0 = arith.constant 0 : i32
    %c0_i32_1 = arith.constant 0 : i32
    return %c0_i32, %c0_i32_0 : i32, i32
  }
  func.func @transform_5(%arg0: i32) -> (i32, i32) {
    %c0_i32 = arith.constant 0 : i32
    %c0_i32_0 = arith.constant 0 : i32
    return %arg0, %c0_i32 : i32, i32
  }
}

</mosaic_0001>

<bundles_post_ra>
// kernel: sub.113
= control target key start
LH: loop header
LB: loop body
LE: loop exit
PB: predicated region body
PF: predicated region fallthrough
CT: control target
= control target key end

     0   :  { %3 = vsyncpa [#allocation1], 0  ;;  %s104_s0 = inlined_call_operand.hbm [shape: f32[3], index: 0, kind: input, shape index: {}]   ;;  %s105_s1 = inlined_call_operand.hbm [shape: f32[3], index: 1, kind: input, shape index: {}]   ;;  %s106_s2 = inlined_call_operand.vmem [shape: f32[3], index: 2, kind: output, shape index: {}]  }
   0x1   :  { %4 = vsyncpa [#allocation3], 0  ;;  %s78_s9 = smov [#allocation0]   ;;  %s79_s11 = smov [#allocation2]  }
   0x2   :  { %s9_s10 = sshll.u32 %s78_s9, 4  ;;  %s17_s12 = sshll.u32 %s79_s11, 4  ;;  %s10_s10 = int_to_ptr.vmem [resolvable:$true] %s9_s10  ;;  %s18_s12 = int_to_ptr.vmem [resolvable:$true] %s17_s12 }
   0x3   :  { %s42_s13 = scalar_lea.vmem %s10_s10, 16  ;;  %s46_s14 = scalar_lea.vmem %s10_s10, 32 }
   0x4   :  { %p43_p0 = scmp.ne.s32.totalorder %s10_s10, %s42_s13  ;;  %p47_p1 = scmp.lt.s32.totalorder %s10_s10, %s10_s10 }
   0x5   :  { %p48_p2 = scmp.lt.s32.totalorder %s46_s14, %s42_s13 }
   0x7   :  { %p49_p3 = por %p48_p2, %p47_p1 }
   0x9   :  { %p50_p4 = pnand %p49_p3, %p43_p0 }
   0xb   :  { %53 = shalt.err (!%p50_p4)
}
   0xc   :  { %12 = dma.hbm_to_vmem [thread:$0]  %s104_s0, 16, %s10_s10, [#allocation1]  }
   0xd   :  { %s62_s0 = scalar_lea.vmem %s18_s12, 16  ;;  %s66_s17 = scalar_lea.vmem %s18_s12, 32 }
   0xe   :  { %p63_p5 = scmp.ne.s32.totalorder %s18_s12, %s62_s0  ;;  %p67_p6 = scmp.lt.s32.totalorder %s18_s12, %s18_s12 }
   0xf   :  { %p68_p7 = scmp.lt.s32.totalorder %s66_s17, %s62_s0 }
  0x11   :  { %p69_p8 = por %p68_p7, %p67_p6 }
  0x13   :  { %p70_p9 = pnand %p69_p8, %p63_p5 }
  0x15   :  { %73 = shalt.err (!%p70_p9)
}
  0x16   :  { %20 = dma.hbm_to_vmem [thread:$0]  %s105_s1, 16, %s18_s12, [#allocation3]  }
  0x17   :  { %74 = dma.done.wait [#allocation1], 16  }
  0x18   :  { %75 = vsyncadd [#allocation1], 4294967280 }
  0x19   :  { %76 = dma.done.wait [#allocation3], 16  }
  0x1a   :  { %77 = vsyncadd [#allocation3], 4294967280  ;;  %v23_v0 = vld [vmem:[#allocation0] sm:$0x1]  ;;  %v24_v1 = vld [vmem:[#allocation2] sm:$0x1] }
  0x1b   :  { %v27_v2 = vsub.f32 %v23_v0, %v24_v1 }
  0x1d   :  { %29 = vst [vmem:[%s106_s2] sm:$0x1] %v27_v2 }
  0x1e   :  { %30 = vsyncpa [#allocation1], 1 }
  0x1f   :  { %31 = vsyncpa [#allocation3], 1 }

// kernel: vanilla_mlp_forward.1
= control target key start
LH: loop header
LB: loop body
LE: loop exit
PB: predicated region body
PF: predicated region fallthrough
CT: control target
= control target key end

     0   :  { %s843_s18 = smov 0   ;;  %s935_s0 = inlined_call_operand.vmem [shape: bf16[256,16], index: 0, kind: input, shape index: {}]   ;;  %s936_s1 = inlined_call_operand.vmem [shape: bf16[16,64], index: 1, kind: input, shape index: {}]   ;;  %s937_s2 = inlined_call_operand.vmem [shape: f32[1,64], index: 2, kind: input, shape index: {}]   ;;  %s938_s3 = inlined_call_operand.vmem [shape: bf16[64,16], index: 3, kind: input, shape index: {}]   ;;  %s939_s4 = inlined_call_operand.vmem [shape: f32[1,16], index: 4, kind: input, shape index: {}]   ;;  %s940_s5 = inlined_call_operand.vmem [shape: f32[256,16], index: 5, kind: output, shape index: {}]  }
   0x1 LB: > { %s679_s19 = sadd.s32 4294967295, %s811_s18   ;;  %p683_p0 = scmp.ge.s32.totalorder %s811_s18, 1  ;;  %s811_s18 = sphi %s843_s18, %s15_s18  }
   0x2   : > { %p188_p1 = scmp.lt.s32.totalorder %s811_s18, 3 }
   0x4   : > { %p189_p2 = pnand %p683_p0, %p188_p1 }
   0x5   : > { %s684_s22 = sshll.u32 (!%p189_p2), %s679_s19, 4 }
   0x6   : > { %192 = sbr.rel (%p189_p2) target bundleno = 448 (0x1c0), region = 40  ;;  %p217_p3 = scmp.lt.s32.totalorder (!%p189_p2), %s684_s22, 31 }
   0xb   : > { %v792_v0 = vld [vmem:[%s936_s1] sm:$0xff]   ;;  %v801_v1 = vld [vmem:[%s938_s3 + $0x18] sm:$0xff]   ;;  %s942_s22 = smov (!%p217_p3, %s684_s22), 31  ;;  %vm300_vm0 = vcmask 130048   ;;  %v802_v10 = vld [vmem:[%s938_s3 + $0x10] sm:$0xff]   ;;  %vm485_vm1 = vcmask 523264  }
   0xc   : > { %742 = vmatprep.subr.bf16.mxu0 %v792_v0  ;;  %760 = vmatprep.subr.bf16.mxu1 %v801_v1  ;;  %s685_s25 = sshll.u32 %s942_s22, 2  ;;  %v803_v11 = vld [vmem:[%s938_s3 + $0x8] sm:$0xff]   ;;  %v804_v12 = vld [vmem:[%s938_s3] sm:$0xff]   ;;  %s687_s12 = sshll.u32 %s942_s22, 3 }
   0xd   : > { %743 = vmatpush3.bf16.msra.mxu0 %v792_v0  ;;  %761 = vmatpush3.bf16.msra.mxu1 %v801_v1  ;;  %s220_s28 = scalar_lea.vmem %s935_s0, %s685_s25  ;;  %v688_v15 = vld [vmem:[%s937_s2] ss:$0 sm:$0xff]  ;;  %s898_s17 = scalar_lea.vmem %s940_s5, %s687_s12 }
   0xe   : > { %v793_v2 = vld [vmem:[%s220_s28] sm:$0xff]   ;;  %v794_v3 = vld [vmem:[%s220_s28 + $0x8] sm:$0xff]   ;;  %v795_v4 = vld [vmem:[%s220_s28 + $0x10] sm:$0xff]   ;;  %762 = vmatprep.subr.bf16.mxu1 %v802_v10 }
   0xf   : > { %744 = vmatprep.mubr.msk.bf16.mxu0 %vm300_vm0, %v793_v2  ;;  %v796_v5 = vld [vmem:[%s220_s28 + $0x18] sm:$0xff]   ;;  %v797_v6 = vld [vmem:[%s220_s28 + $0x20] sm:$0xff]   ;;  %v798_v7 = vld [vmem:[%s220_s28 + $0x28] sm:$0xff]  }
  0x10   : > { %745 = vmatmul.mubr.msk.bf16.vlgmr.msra.gmra.mxu0 %vm300_vm0, %v794_v3  ;;  %v799_v8 = vld [vmem:[%s220_s28 + $0x30] sm:$0xff]   ;;  %v800_v9 = vld [vmem:[%s220_s28 + $0x38] sm:$0xff]  }
  0x11   : > { %748 = vmatprep.mubr.msk.bf16.mxu0 %vm300_vm0, %v795_v4  ;;  %763 = vmatpush3.bf16.msra.mxu1 %v802_v10 }
  0x12   : > { %764 = vmatprep.subr.bf16.mxu1 %v803_v11 }
  0x15   : > { %765 = vmatpush3.bf16.msra.mxu1 %v803_v11 }
  0x16   : > { %766 = vmatprep.subr.bf16.mxu1 %v804_v12 }
  0x18   : > { %749 = vmatmul.mubr.msk.bf16.gmra.mxu0 %vm300_vm0, %v796_v5 }
  0x19   : > { %752 = vmatprep.mubr.msk.bf16.mxu0 %vm300_vm0, %v797_v6  ;;  %767 = vmatpush3.bf16.msra.mxu1 %v804_v12  ;;  %v706_v6 = vld [vmem:[%s939_s4] ss:$0 sm:$0xff] }
  0x20   : > { %753 = vmatmul.mubr.msk.bf16.gmra.mxu0 %vm300_vm0, %v798_v7 }
  0x21   : > { %756 = vmatprep.mubr.msk.bf16.mxu0 %vm300_vm0, %v799_v8 }
  0x28   : > { %757 = vmatmul.mubr.msk.bf16.gmra.mxu0 %vm300_vm0, %v800_v9 }
  0xd0   : > { %v746_v13 = vpop.f32.mrf.mxu0 }
  0xd1   : > { %v368_v19 = vadd.f32 %v746_v13, %v688_v15 }
  0xd2   : > { %v359_v14 = vpop.f32.mrf.mxu0 }
  0xd3   : > { %v360_v17 = vadd.f32 %v688_v15, %v359_v14  ;;  %v424_v26 = vmax.f32 %v368_v19, 0.0 }
  0xd4   : > { %v747_v16 = vpop.f32.mrf.mxu0 }
  0xd5   : > { %v371_v18 = vadd.f32 %v747_v16, %v688_v15  ;;  %v422_v24 = vmax.f32 %v360_v17, 0.0 }
  0xd6   : > { %v362_v20 = vpop.f32.mrf.mxu0 }
  0xd7   : > { %v363_v21 = vadd.f32 %v688_v15, %v362_v20  ;;  %v425_v22 = vmax.f32 %v371_v18, 0.0 }
  0xd8   : > { %v750_v23 = vpop.f32.mrf.mxu0 }
  0xd9   : > { %v423_v25 = vmax.f32 %v363_v21, 0.0  ;;  %v439_v29 = vpack.c.bf16 %v425_v22, %v424_v26  ;;  %v384_v33 = vadd.f32 %v750_v23, %v688_v15 }
  0xda   : > { %v375_v27 = vpop.f32.mrf.mxu0 }
  0xdb   : > { %v438_v28 = vpack.c.bf16 %v423_v25, %v422_v24  ;;  %v376_v31 = vadd.f32 %v688_v15, %v375_v27  ;;  %v428_v40 = vmax.f32 %v384_v33, 0.0 }
  0xdc   : > { %v751_v30 = vpop.f32.mrf.mxu0 }
  0xdd   : > { %v387_v32 = vadd.f32 %v751_v30, %v688_v15  ;;  %768 = vmatprep.mubr.msk.bf16.mxu1 %vm485_vm1, %v438_v28  ;;  %v426_v38 = vmax.f32 %v376_v31, 0.0 }
  0xde   : > { %v378_v34 = vpop.f32.mrf.mxu0  ;;  %769 = vmatmul.mubr.msk.bf16.vlgmr.msra.gmra.mxu1 %vm485_vm1, %v439_v29 }
  0xdf   : > { %v379_v35 = vadd.f32 %v688_v15, %v378_v34  ;;  %v429_v36 = vmax.f32 %v387_v32, 0.0 }
  0xe0   : > { %v754_v37 = vpop.f32.mrf.mxu0 }
  0xe1   : > { %v427_v39 = vmax.f32 %v379_v35, 0.0  ;;  %v441_v43 = vpack.c.bf16 %v429_v36, %v428_v40  ;;  %v400_v47 = vadd.f32 %v754_v37, %v688_v15 }
  0xe2   : > { %v391_v41 = vpop.f32.mrf.mxu0 }
  0xe3   : > { %v440_v42 = vpack.c.bf16 %v427_v39, %v426_v38  ;;  %v392_v45 = vadd.f32 %v688_v15, %v391_v41  ;;  %v432_v54 = vmax.f32 %v400_v47, 0.0 }
  0xe4   : > { %v755_v44 = vpop.f32.mrf.mxu0 }
  0xe5   : > { %v403_v46 = vadd.f32 %v755_v44, %v688_v15  ;;  %772 = vmatprep.mubr.msk.bf16.mxu1 %vm485_vm1, %v440_v42  ;;  %v430_v52 = vmax.f32 %v392_v45, 0.0 }
  0xe6   : > { %v394_v48 = vpop.f32.mrf.mxu0  ;;  %773 = vmatmul.mubr.msk.bf16.gmra.mxu1 %vm485_vm1, %v441_v43 }
  0xe7   : > { %v395_v49 = vadd.f32 %v688_v15, %v394_v48  ;;  %v433_v50 = vmax.f32 %v403_v46, 0.0 }
  0xe8   : > { %v758_v51 = vpop.f32.mrf.mxu0 }
  0xe9   : > { %v431_v53 = vmax.f32 %v395_v49, 0.0  ;;  %v443_v57 = vpack.c.bf16 %v433_v50, %v432_v54  ;;  %v416_v61 = vadd.f32 %v758_v51, %v688_v15 }
  0xea   : > { %v407_v55 = vpop.f32.mrf.mxu0 }
  0xeb   : > { %v442_v56 = vpack.c.bf16 %v431_v53, %v430_v52  ;;  %v408_v59 = vadd.f32 %v688_v15, %v407_v55  ;;  %v436_v3 = vmax.f32 %v416_v61, 0.0 }
  0xec   : > { %v759_v58 = vpop.f32.mrf.mxu0 }
  0xed   : > { %v419_v60 = vadd.f32 %v759_v58, %v688_v15  ;;  %776 = vmatprep.mubr.msk.bf16.mxu1 %vm485_vm1, %v442_v56  ;;  %v434_v1 = vmax.f32 %v408_v59, 0.0 }
  0xee   : > { %v410_v62 = vpop.f32.mrf.mxu0  ;;  %777 = vmatmul.mubr.msk.bf16.gmra.mxu1 %vm485_vm1, %v443_v57 }
  0xef   : > { %v411_v63 = vadd.f32 %v688_v15, %v410_v62  ;;  %v437_v0 = vmax.f32 %v419_v60, 0.0 }
  0xf1   : > { %v435_v2 = vmax.f32 %v411_v63, 0.0  ;;  %v445_v5 = vpack.c.bf16 %v437_v0, %v436_v3 }
  0xf3   : > { %v444_v4 = vpack.c.bf16 %v435_v2, %v434_v1 }
  0xf5   : > { %780 = vmatprep.mubr.msk.bf16.mxu1 %vm485_vm1, %v444_v4 }
  0xf6   : > { %781 = vmatmul.mubr.msk.bf16.gmra.mxu1 %vm485_vm1, %v445_v5 }
 0x19e   : > { %v770_v7 = vpop.f32.mrf.mxu1 }
 0x19f   : > { %v553_v8 = vadd.f32 %v770_v7, %v706_v6 }
 0x1a0   : > { %v544_v9 = vpop.f32.mrf.mxu1 }
 0x1a1   : > { %609 = vst.msk [vmem:[%s898_s17 + $0x10] sm:$0xff] %vm300_vm0, %v553_v8  ;;  %v545_v10 = vadd.f32 %v706_v6, %v544_v9 }
 0x1a2   : > { %v771_v11 = vpop.f32.mrf.mxu1 }
 0x1a3   : > { %607 = vst.msk [vmem:[%s898_s17] sm:$0xff] %vm300_vm0, %v545_v10  ;;  %v556_v12 = vadd.f32 %v771_v11, %v706_v6 }
 0x1a4   : > { %v547_v13 = vpop.f32.mrf.mxu1 }
 0x1a5   : > { %610 = vst.msk [vmem:[%s898_s17 + $0x18] sm:$0xff] %vm300_vm0, %v556_v12  ;;  %v548_v14 = vadd.f32 %v706_v6, %v547_v13 }
 0x1a6   : > { %v774_v15 = vpop.f32.mrf.mxu1 }
 0x1a7   : > { %608 = vst.msk [vmem:[%s898_s17 + $0x8] sm:$0xff] %vm300_vm0, %v548_v14  ;;  %v569_v16 = vadd.f32 %v774_v15, %v706_v6 }
 0x1a8   : > { %v560_v17 = vpop.f32.mrf.mxu1 }
 0x1a9   : > { %613 = vst.msk [vmem:[%s898_s17 + $0x30] sm:$0xff] %vm300_vm0, %v569_v16  ;;  %v561_v18 = vadd.f32 %v706_v6, %v560_v17 }
 0x1aa   : > { %v775_v19 = vpop.f32.mrf.mxu1 }
 0x1ab   : > { %611 = vst.msk [vmem:[%s898_s17 + $0x20] sm:$0xff] %vm300_vm0, %v561_v18  ;;  %v572_v20 = vadd.f32 %v775_v19, %v706_v6 }
 0x1ac   : > { %v563_v21 = vpop.f32.mrf.mxu1 }
 0x1ad   : > { %614 = vst.msk [vmem:[%s898_s17 + $0x38] sm:$0xff] %vm300_vm0, %v572_v20  ;;  %v564_v22 = vadd.f32 %v706_v6, %v563_v21 }
 0x1ae   : > { %v778_v23 = vpop.f32.mrf.mxu1 }
 0x1af   : > { %612 = vst.msk [vmem:[%s898_s17 + $0x28] sm:$0xff] %vm300_vm0, %v564_v22  ;;  %v585_v24 = vadd.f32 %v778_v23, %v706_v6 }
 0x1b0   : > { %v576_v25 = vpop.f32.mrf.mxu1 }
 0x1b1   : > { %617 = vst.msk [vmem:[%s898_s17 + $0x50] sm:$0xff] %vm300_vm0, %v585_v24  ;;  %v577_v26 = vadd.f32 %v706_v6, %v576_v25 }
 0x1b2   : > { %v779_v27 = vpop.f32.mrf.mxu1 }
 0x1b3   : > { %615 = vst.msk [vmem:[%s898_s17 + $0x40] sm:$0xff] %vm300_vm0, %v577_v26  ;;  %v588_v28 = vadd.f32 %v779_v27, %v706_v6 }
 0x1b4   : > { %v579_v29 = vpop.f32.mrf.mxu1 }
 0x1b5   : > { %618 = vst.msk [vmem:[%s898_s17 + $0x58] sm:$0xff] %vm300_vm0, %v588_v28  ;;  %v580_v30 = vadd.f32 %v706_v6, %v579_v29 }
 0x1b6   : > { %v782_v31 = vpop.f32.mrf.mxu1 }
 0x1b7   : > { %616 = vst.msk [vmem:[%s898_s17 + $0x48] sm:$0xff] %vm300_vm0, %v580_v30  ;;  %v601_v32 = vadd.f32 %v782_v31, %v706_v6 }
 0x1b8   : > { %v592_v33 = vpop.f32.mrf.mxu1 }
 0x1b9   : > { %621 = vst.msk [vmem:[%s898_s17 + $0x70] sm:$0xff] %vm300_vm0, %v601_v32  ;;  %v593_v34 = vadd.f32 %v706_v6, %v592_v33 }
 0x1ba   : > { %v783_v35 = vpop.f32.mrf.mxu1 }
 0x1bb   : > { %619 = vst.msk [vmem:[%s898_s17 + $0x60] sm:$0xff] %vm300_vm0, %v593_v34  ;;  %v604_v36 = vadd.f32 %v783_v35, %v706_v6 }
 0x1bc   : > { %v595_v37 = vpop.f32.mrf.mxu1 }
 0x1bd   : > { %622 = vst.msk [vmem:[%s898_s17 + $0x78] sm:$0xff] %vm300_vm0, %v604_v36  ;;  %v596_v38 = vadd.f32 %v706_v6, %v595_v37 }
 0x1bf   : > { %620 = vst.msk [vmem:[%s898_s17 + $0x68] sm:$0xff] %vm300_vm0, %v596_v38 }
 0x1c0 PF: > { %s15_s18 = sadd.s32 1, %s811_s18  }
 0x1c1   : > { %p12_p4 = scmp.ge.s32.totalorder %s15_s18, 4  }
 0x1c3   :  { %14 = sbr.rel (!%p12_p4) target bundleno = 1 (0x1), region = 70 }

</bundles_post_ra>
